<compile_context>
chip_gen: v7x
topology: tpu7x:2x2x1
jax: 0.10.0
libtpu: 0.0.40
codegen_flags: <defaults>
</compile_context>

<pallas_src>
import functools

import jax
import jax.numpy as jnp
from jax import lax
from jax.experimental import pallas as pl
from jax.experimental.pallas import tpu as pltpu


def _spatial_block_kernel(x_ref, w1_ref, scale_ref, shift_ref, w2_ref, b2_ref,
                          maskl_ref, maskr_ref, o_ref, hpad_ref, *, H, W, pad):
    """Fused 1x1conv+BN+ReLU -> 3x3 conv (9 shifted-slice matmuls), one batch.

    x_ref      : (Cin,  H*W)          f32   (NCHW slice, spatial on lanes)
    w1_ref     : (Chid_p, Cin)        bf16  (Chid zero-padded to 16-multiple)
    scale_ref  : (Chid_p, 1)          f32   gamma / sqrt(var+eps)   (pad rows 0)
    shift_ref  : (Chid_p, 1)          f32   (b1-mean)*scale + beta  (pad rows 0)
    w2_ref     : (9, Cout, Chid_p)    bf16  tap-major (kh*3+kw)
    b2_ref     : (Cout, 1)            f32
    maskl_ref  : (1, H*W)             bf16  0 where col==0   else 1
    maskr_ref  : (1, H*W)             bf16  0 where col==W-1 else 1
    o_ref      : (Cout, H*W)          f32
    hpad_ref   : (Chid_p, 2*pad+H*W)  bf16  row-halo padded hidden (scratch)
    """
    Chid_p = w1_ref.shape[0]
    Cout = o_ref.shape[0]
    HW = H * W

    # ---- stage 1: 1x1 conv + folded BN + ReLU (hidden never leaves VMEM) ----
    x_bf = x_ref[...].astype(jnp.bfloat16)                            # (Cin, HW)
    h = jnp.dot(w1_ref[...], x_bf, preferred_element_type=jnp.float32)
    h = jnp.maximum(h * scale_ref[...] + shift_ref[...], 0.0)         # (Chid_p, HW)

    # ---- stage 2: bf16 row-halo padded flat buffer ---------------------------
    hpad_ref[:, :pad] = jnp.zeros((Chid_p, pad), jnp.bfloat16)
    hpad_ref[:, pad + HW:] = jnp.zeros((Chid_p, pad), jnp.bfloat16)
    hpad_ref[:, pad:pad + HW] = h.astype(jnp.bfloat16)                 # whole-tile store

    # ---- stage 3: 9 per-tap matmuls, accumulated in f32 vregs ----------------
    mask_l = maskl_ref[...]                                            # (1, HW) bf16
    mask_r = maskr_ref[...]
    acc = jnp.zeros((Cout, HW), jnp.float32)
    for kh in range(3):
        for kw in range(3):
            dh, dw = kh - 1, kw - 1
            off = pad + dh * W + dw                                    # static slice start
            part = hpad_ref[:, off:off + HW]                           # (Chid_p, HW) bf16
            if dw == -1:
                part = part * mask_l
            elif dw == 1:
                part = part * mask_r
            acc = acc + jnp.dot(w2_ref[kh * 3 + kw], part,
                                preferred_element_type=jnp.float32)    # (Cout, HW)

    o_ref[...] = (acc + b2_ref[...]).astype(o_ref.dtype)


def spatial_block_forward(x_nchw, params, shuffle=False):
    """NCHW in / NCHW out, matching the PyTorch module (inference-mode BN)."""
    del shuffle  # numerically a no-op in the reference module (see header note)
    w1, b1 = params["w1"], params["b1"]
    gamma, beta = params["gamma"], params["beta"]
    mean, var, eps = params["mean"], params["var"], params["eps"]
    w2, b2 = params["w2"], params["b2"]

    N, Cin, H, W = x_nchw.shape
    Chid = w1.shape[0]
    Cout = w2.shape[0]
    HW = H * W
    pad = ((W + 1 + 127) // 128) * 128       # lane-aligned row halo, >= W+1
    Chid_p = ((Chid + 15) // 16) * 16        # bf16 sublane-packing multiple

    # Fold conv1 bias + BN into per-channel scale/shift; zero-pad Chid -> Chid_p.
    scale = (gamma / jnp.sqrt(var + eps)).astype(jnp.float32)          # (Chid,)
    shift = ((b1 - mean) * scale + beta).astype(jnp.float32)           # (Chid,)
    scale_p = jnp.zeros((Chid_p, 1), jnp.float32).at[:Chid, 0].set(scale)
    shift_p = jnp.zeros((Chid_p, 1), jnp.float32).at[:Chid, 0].set(shift)

    w1_p = jnp.zeros((Chid_p, Cin), jnp.float32).at[:Chid].set(w1[:, :, 0, 0])
    w1_p = w1_p.astype(jnp.bfloat16)                                   # (Chid_p, Cin)

    # (Cout, Chid, 3, 3) -> (9, Cout, Chid_p), tap-major (kh*3+kw), zero-padded.
    w2_p = jnp.zeros((Cout, Chid_p, 3, 3), jnp.float32).at[:, :Chid].set(w2)
    w2_taps = jnp.transpose(w2_p, (2, 3, 0, 1)).reshape(9, Cout, Chid_p)
    w2_taps = w2_taps.astype(jnp.bfloat16)

    # Column-halo masks as 0/1 bf16 rows (computed once on the host).
    col = jnp.tile(jnp.arange(W, dtype=jnp.int32), H)                  # (HW,)
    mask_l = (col > 0).astype(jnp.bfloat16).reshape(1, HW)
    mask_r = (col < (W - 1)).astype(jnp.bfloat16).reshape(1, HW)

    # Explicit scoped-VMEM budget (x/out double-buffers + weights + scratch).
    vmem_bytes = (
        2 * Cin * HW * 4                      # x double-buffer
        + 2 * Cout * HW * 4                   # out double-buffer
        + 2 * (Chid_p * Cin * 2 + 9 * Cout * Chid_p * 2
               + 2 * Chid_p * 4 + Cout * 4 + 2 * HW * 2)   # weights/masks buffers
        + Chid_p * (2 * pad + HW) * 2         # hpad scratch (bf16)
    )
    vmem_limit = min(max(int(vmem_bytes * 1.5) + (4 << 20), 32 << 20), 64 << 20)

    kernel = functools.partial(_spatial_block_kernel, H=H, W=W, pad=pad)

    out_flat = pl.pallas_call(
        kernel,
        out_shape=jax.ShapeDtypeStruct((N, Cout, HW), jnp.float32),
        grid=(N,),
        in_specs=[
            pl.BlockSpec((None, Cin, HW), lambda n: (n, 0, 0)),        # x (N,C,HW view)
            pl.BlockSpec((Chid_p, Cin), lambda n: (0, 0)),             # w1 (bf16)
            pl.BlockSpec((Chid_p, 1), lambda n: (0, 0)),               # scale
            pl.BlockSpec((Chid_p, 1), lambda n: (0, 0)),               # shift
            pl.BlockSpec((9, Cout, Chid_p), lambda n: (0, 0, 0)),      # w2 taps (bf16)
            pl.BlockSpec((Cout, 1), lambda n: (0, 0)),                 # b2
            pl.BlockSpec((1, HW), lambda n: (0, 0)),                   # mask_l
            pl.BlockSpec((1, HW), lambda n: (0, 0)),                   # mask_r
        ],
        out_specs=pl.BlockSpec((None, Cout, HW), lambda n: (n, 0, 0)),
        scratch_shapes=[
            pltpu.VMEM((Chid_p, 2 * pad + HW), jnp.bfloat16),          # padded hidden
        ],
        compiler_params=pltpu.CompilerParams(
            dimension_semantics=("parallel",),
            vmem_limit_bytes=vmem_limit),
    )(
        x_nchw.reshape(N, Cin, HW),          # free reshape, stays NCHW in HBM
        w1_p,
        scale_p,
        shift_p,
        w2_taps,
        b2.astype(jnp.float32).reshape(Cout, 1),
        mask_l,
        mask_r,
    )
    return out_flat.reshape(N, Cout, H, W)   # free reshape back to NCHW


# ----------------------------------------------------------------------------
# Pure-JAX f32 reference (sanity check).
# ----------------------------------------------------------------------------
def _reference(x_nchw, params):
    w1, b1 = params["w1"], params["b1"]
    gamma, beta = params["gamma"], params["beta"]
    mean, var, eps = params["mean"], params["var"], params["eps"]
    w2, b2 = params["w2"], params["b2"]
    x = jnp.transpose(x_nchw, (0, 2, 3, 1))
    w1_hwio = jnp.transpose(w1, (2, 3, 1, 0))
    y = lax.conv_general_dilated(x, w1_hwio, (1, 1), "VALID",
                                 dimension_numbers=("NHWC", "HWIO", "NHWC")) + b1
    y = (y - mean) * gamma / jnp.sqrt(var + eps) + beta
    y = jnp.maximum(y, 0.0)
    w2_hwio = jnp.transpose(w2, (2, 3, 1, 0))
    z = lax.conv_general_dilated(y, w2_hwio, (1, 1), "SAME",
                                 dimension_numbers=("NHWC", "HWIO", "NHWC")) + b2
    return jnp.transpose(z, (0, 3, 1, 2))


if __name__ == "__main__":
    # Shapes consistent with the module: hidden_dim = 0.25 * in_dim, out_dim = in_dim
    N, Cin, H, W = 2, 16, 16, 16
    Chid, Cout = 4, 16

    key = jax.random.PRNGKey(0)
    k_x, k_w1, k_b1, k_w2, k_b2 = jax.random.split(key, 5)

    x = jax.random.normal(k_x, (N, Cin, H, W), jnp.float32)

    params = {
        "w1": jax.random.normal(k_w1, (Chid, Cin, 1, 1), jnp.float32) * 0.1,
        "b1": jax.random.normal(k_b1, (Chid,), jnp.float32) * 0.1,
        "gamma": jnp.ones((Chid,), jnp.float32),
        "beta": jnp.zeros((Chid,), jnp.float32),
        "mean": jnp.zeros((Chid,), jnp.float32),
        "var": jnp.ones((Chid,), jnp.float32),
        "eps": 1e-5,
        "w2": jax.random.normal(k_w2, (Cout, Chid, 3, 3), jnp.float32) * 0.1,
        "b2": jax.random.normal(k_b2, (Cout,), jnp.float32) * 0.1,
    }

    out = spatial_block_forward(x, params, shuffle=False)
    out = jax.block_until_ready(out)

    ref = jax.block_until_ready(_reference(x, params))
    assert out.shape == (N, Cout, H, W)
    # bf16 MXU operands with f32 accumulation -> bf16-sized tolerance
    assert jnp.allclose(out, ref, atol=2e-2, rtol=2e-2)

    print("KERNEL_OK")
</pallas_src>

<mosaic_0001>
module attributes {stable_mosaic.version = 11 : i64} {
  func.func @_spatial_block_kernel(%arg0: i32, %arg1: memref<1x16x256xf32, #tpu.memory_space<vmem>>, %arg2: memref<16x16xbf16, #tpu.memory_space<vmem>>, %arg3: memref<16x1xf32, #tpu.memory_space<vmem>>, %arg4: memref<16x1xf32, #tpu.memory_space<vmem>>, %arg5: memref<9x16x16xbf16, #tpu.memory_space<vmem>>, %arg6: memref<16x1xf32, #tpu.memory_space<vmem>>, %arg7: memref<1x256xbf16, #tpu.memory_space<vmem>>, %arg8: memref<1x256xbf16, #tpu.memory_space<vmem>>, %arg9: memref<1x16x256xf32, #tpu.memory_space<vmem>>, %arg10: memref<16x512xbf16, #tpu.memory_space<vmem>>) attributes {dimension_semantics = [#tpu.dimension_semantics<parallel>], iteration_bounds = array<i64: 2>, scalar_prefetch = 0 : i64, scratch_operands = 1 : i64, tpu.core_type = #tpu.core_type<tc>, window_params = [{transform_indices = @transform_0, window_bounds = array<i64: 1, 16, 256>}, {pipeline_mode = #tpu.pipeline_mode<synchronous>, transform_indices = @transform_1, window_bounds = array<i64: 16, 16>}, {pipeline_mode = #tpu.pipeline_mode<synchronous>, transform_indices = @transform_2, window_bounds = array<i64: 16, 1>}, {pipeline_mode = #tpu.pipeline_mode<synchronous>, transform_indices = @transform_3, window_bounds = array<i64: 16, 1>}, {pipeline_mode = #tpu.pipeline_mode<synchronous>, transform_indices = @transform_4, window_bounds = array<i64: 9, 16, 16>}, {pipeline_mode = #tpu.pipeline_mode<synchronous>, transform_indices = @transform_5, window_bounds = array<i64: 16, 1>}, {pipeline_mode = #tpu.pipeline_mode<synchronous>, transform_indices = @transform_6, window_bounds = array<i64: 1, 256>}, {pipeline_mode = #tpu.pipeline_mode<synchronous>, transform_indices = @transform_7, window_bounds = array<i64: 1, 256>}, {transform_indices = @transform_8, window_bounds = array<i64: 1, 16, 256>}]} {
    %c0 = arith.constant 0 : index
    %c0_0 = arith.constant 0 : index
    %c0_1 = arith.constant 0 : index
    %0 = vector.load %arg1[%c0, %c0_0, %c0_1] : memref<1x16x256xf32, #tpu.memory_space<vmem>>, vector<1x16x256xf32>
    %1 = vector.shape_cast %0 : vector<1x16x256xf32> to vector<16x256xf32>
    %2 = arith.truncf %1 : vector<16x256xf32> to vector<16x256xbf16>
    %c0_2 = arith.constant 0 : index
    %c0_3 = arith.constant 0 : index
    %3 = vector.load %arg2[%c0_2, %c0_3] : memref<16x16xbf16, #tpu.memory_space<vmem>>, vector<16x16xbf16>
    %cst = arith.constant dense<0.000000e+00> : vector<16x256xf32>
    %4 = tpu.matmul %3, %2, %cst {dimension_numbers = #tpu.dot_dimension_numbers<[1], [0], [0], [1], [0, 0, 1, 1], [], []>} : vector<16x16xbf16>, vector<16x256xbf16>, vector<16x256xf32> -> vector<16x256xf32>
    %c0_4 = arith.constant 0 : index
    %c0_5 = arith.constant 0 : index
    %5 = vector.load %arg3[%c0_4, %c0_5] : memref<16x1xf32, #tpu.memory_space<vmem>>, vector<16x1xf32>
    %6 = vector.broadcast %5 : vector<16x1xf32> to vector<16x256xf32>
    %7 = arith.mulf %4, %6 : vector<16x256xf32>
    %c0_6 = arith.constant 0 : index
    %c0_7 = arith.constant 0 : index
    %8 = vector.load %arg4[%c0_6, %c0_7] : memref<16x1xf32, #tpu.memory_space<vmem>>, vector<16x1xf32>
    %9 = vector.broadcast %8 : vector<16x1xf32> to vector<16x256xf32>
    %10 = arith.addf %7, %9 : vector<16x256xf32>
    %cst_8 = arith.constant 0.000000e+00 : f32
    %11 = vector.broadcast %cst_8 : f32 to vector<16x256xf32>
    %12 = arith.maximumf %10, %11 : vector<16x256xf32>
    %cst_9 = arith.constant 0.000000e+00 : bf16
    %13 = vector.broadcast %cst_9 : bf16 to vector<16x128xbf16>
    %c0_10 = arith.constant 0 : index
    %c0_11 = arith.constant 0 : index
    %14 = vector.load %arg10[%c0_10, %c0_11] : memref<16x512xbf16, #tpu.memory_space<vmem>>, vector<16x128xbf16>
    tpu.vector_store %arg10[%c0_10, %c0_11], %13 {strides = array<i32>} : memref<16x512xbf16, #tpu.memory_space<vmem>>, vector<16x128xbf16>,
    %cst_12 = arith.constant 0.000000e+00 : bf16
    %15 = vector.broadcast %cst_12 : bf16 to vector<16x128xbf16>
    %c0_13 = arith.constant 0 : index
    %c384 = arith.constant 384 : index
    %16 = vector.load %arg10[%c0_13, %c384] : memref<16x512xbf16, #tpu.memory_space<vmem>>, vector<16x128xbf16>
    tpu.vector_store %arg10[%c0_13, %c384], %15 {strides = array<i32>} : memref<16x512xbf16, #tpu.memory_space<vmem>>, vector<16x128xbf16>,
    %17 = arith.truncf %12 : vector<16x256xf32> to vector<16x256xbf16>
    %c0_14 = arith.constant 0 : index
    %c128 = arith.constant 128 : index
    %18 = vector.load %arg10[%c0_14, %c128] : memref<16x512xbf16, #tpu.memory_space<vmem>>, vector<16x256xbf16>
    tpu.vector_store %arg10[%c0_14, %c128], %17 {strides = array<i32>} : memref<16x512xbf16, #tpu.memory_space<vmem>>, vector<16x256xbf16>,
    %c0_15 = arith.constant 0 : index
    %c0_16 = arith.constant 0 : index
    %19 = vector.load %arg7[%c0_15, %c0_16] : memref<1x256xbf16, #tpu.memory_space<vmem>>, vector<1x256xbf16>
    %c0_17 = arith.constant 0 : index
    %c0_18 = arith.constant 0 : index
    %20 = vector.load %arg8[%c0_17, %c0_18] : memref<1x256xbf16, #tpu.memory_space<vmem>>, vector<1x256xbf16>
    %cst_19 = arith.constant 0.000000e+00 : f32
    %21 = vector.broadcast %cst_19 : f32 to vector<16x256xf32>
    %c0_20 = arith.constant 0 : index
    %c111 = arith.constant 111 : index
    %22 = vector.load %arg10[%c0_20, %c111] : memref<16x512xbf16, #tpu.memory_space<vmem>>, vector<16x256xbf16>
    %23 = vector.broadcast %19 : vector<1x256xbf16> to vector<16x256xbf16>
    %24 = arith.mulf %22, %23 : vector<16x256xbf16>
    %c0_21 = arith.constant 0 : index
    %c0_22 = arith.constant 0 : index
    %c0_23 = arith.constant 0 : index
    %25 = vector.load %arg5[%c0_21, %c0_22, %c0_23] : memref<9x16x16xbf16, #tpu.memory_space<vmem>>, vector<1x16x16xbf16>
    %26 = vector.shape_cast %25 : vector<1x16x16xbf16> to vector<16x16xbf16>
    %cst_24 = arith.constant dense<0.000000e+00> : vector<16x256xf32>
    %27 = tpu.matmul %26, %24, %cst_24 {dimension_numbers = #tpu.dot_dimension_numbers<[1], [0], [0], [1], [0, 0, 1, 1], [], []>} : vector<16x16xbf16>, vector<16x256xbf16>, vector<16x256xf32> -> vector<16x256xf32>
    %28 = arith.addf %21, %27 : vector<16x256xf32>
    %c0_25 = arith.constant 0 : index
    %c112 = arith.constant 112 : index
    %29 = vector.load %arg10[%c0_25, %c112] : memref<16x512xbf16, #tpu.memory_space<vmem>>, vector<16x256xbf16>
    %c1 = arith.constant 1 : index
    %c0_26 = arith.constant 0 : index
    %c0_27 = arith.constant 0 : index
    %30 = vector.load %arg5[%c1, %c0_26, %c0_27] : memref<9x16x16xbf16, #tpu.memory_space<vmem>>, vector<1x16x16xbf16>
    %31 = vector.shape_cast %30 : vector<1x16x16xbf16> to vector<16x16xbf16>
    %cst_28 = arith.constant dense<0.000000e+00> : vector<16x256xf32>
    %32 = tpu.matmul %31, %29, %cst_28 {dimension_numbers = #tpu.dot_dimension_numbers<[1], [0], [0], [1], [0, 0, 1, 1], [], []>} : vector<16x16xbf16>, vector<16x256xbf16>, vector<16x256xf32> -> vector<16x256xf32>
    %33 = arith.addf %28, %32 : vector<16x256xf32>
    %c0_29 = arith.constant 0 : index
    %c113 = arith.constant 113 : index
    %34 = vector.load %arg10[%c0_29, %c113] : memref<16x512xbf16, #tpu.memory_space<vmem>>, vector<16x256xbf16>
    %35 = vector.broadcast %20 : vector<1x256xbf16> to vector<16x256xbf16>
    %36 = arith.mulf %34, %35 : vector<16x256xbf16>
    %c2 = arith.constant 2 : index
    %c0_30 = arith.constant 0 : index
    %c0_31 = arith.constant 0 : index
    %37 = vector.load %arg5[%c2, %c0_30, %c0_31] : memref<9x16x16xbf16, #tpu.memory_space<vmem>>, vector<1x16x16xbf16>
    %38 = vector.shape_cast %37 : vector<1x16x16xbf16> to vector<16x16xbf16>
    %cst_32 = arith.constant dense<0.000000e+00> : vector<16x256xf32>
    %39 = tpu.matmul %38, %36, %cst_32 {dimension_numbers = #tpu.dot_dimension_numbers<[1], [0], [0], [1], [0, 0, 1, 1], [], []>} : vector<16x16xbf16>, vector<16x256xbf16>, vector<16x256xf32> -> vector<16x256xf32>
    %40 = arith.addf %33, %39 : vector<16x256xf32>
    %c0_33 = arith.constant 0 : index
    %c127 = arith.constant 127 : index
    %41 = vector.load %arg10[%c0_33, %c127] : memref<16x512xbf16, #tpu.memory_space<vmem>>, vector<16x256xbf16>
    %42 = vector.broadcast %19 : vector<1x256xbf16> to vector<16x256xbf16>
    %43 = arith.mulf %41, %42 : vector<16x256xbf16>
    %c3 = arith.constant 3 : index
    %c0_34 = arith.constant 0 : index
    %c0_35 = arith.constant 0 : index
    %44 = vector.load %arg5[%c3, %c0_34, %c0_35] : memref<9x16x16xbf16, #tpu.memory_space<vmem>>, vector<1x16x16xbf16>
    %45 = vector.shape_cast %44 : vector<1x16x16xbf16> to vector<16x16xbf16>
    %cst_36 = arith.constant dense<0.000000e+00> : vector<16x256xf32>
    %46 = tpu.matmul %45, %43, %cst_36 {dimension_numbers = #tpu.dot_dimension_numbers<[1], [0], [0], [1], [0, 0, 1, 1], [], []>} : vector<16x16xbf16>, vector<16x256xbf16>, vector<16x256xf32> -> vector<16x256xf32>
    %47 = arith.addf %40, %46 : vector<16x256xf32>
    %c0_37 = arith.constant 0 : index
    %c128_38 = arith.constant 128 : index
    %48 = vector.load %arg10[%c0_37, %c128_38] : memref<16x512xbf16, #tpu.memory_space<vmem>>, vector<16x256xbf16>
    %c4 = arith.constant 4 : index
    %c0_39 = arith.constant 0 : index
    %c0_40 = arith.constant 0 : index
    %49 = vector.load %arg5[%c4, %c0_39, %c0_40] : memref<9x16x16xbf16, #tpu.memory_space<vmem>>, vector<1x16x16xbf16>
    %50 = vector.shape_cast %49 : vector<1x16x16xbf16> to vector<16x16xbf16>
    %cst_41 = arith.constant dense<0.000000e+00> : vector<16x256xf32>
    %51 = tpu.matmul %50, %48, %cst_41 {dimension_numbers = #tpu.dot_dimension_numbers<[1], [0], [0], [1], [0, 0, 1, 1], [], []>} : vector<16x16xbf16>, vector<16x256xbf16>, vector<16x256xf32> -> vector<16x256xf32>
    %52 = arith.addf %47, %51 : vector<16x256xf32>
    %c0_42 = arith.constant 0 : index
    %c129 = arith.constant 129 : index
    %53 = vector.load %arg10[%c0_42, %c129] : memref<16x512xbf16, #tpu.memory_space<vmem>>, vector<16x256xbf16>
    %54 = vector.broadcast %20 : vector<1x256xbf16> to vector<16x256xbf16>
    %55 = arith.mulf %53, %54 : vector<16x256xbf16>
    %c5 = arith.constant 5 : index
    %c0_43 = arith.constant 0 : index
    %c0_44 = arith.constant 0 : index
    %56 = vector.load %arg5[%c5, %c0_43, %c0_44] : memref<9x16x16xbf16, #tpu.memory_space<vmem>>, vector<1x16x16xbf16>
    %57 = vector.shape_cast %56 : vector<1x16x16xbf16> to vector<16x16xbf16>
    %cst_45 = arith.constant dense<0.000000e+00> : vector<16x256xf32>
    %58 = tpu.matmul %57, %55, %cst_45 {dimension_numbers = #tpu.dot_dimension_numbers<[1], [0], [0], [1], [0, 0, 1, 1], [], []>} : vector<16x16xbf16>, vector<16x256xbf16>, vector<16x256xf32> -> vector<16x256xf32>
    %59 = arith.addf %52, %58 : vector<16x256xf32>
    %c0_46 = arith.constant 0 : index
    %c143 = arith.constant 143 : index
    %60 = vector.load %arg10[%c0_46, %c143] : memref<16x512xbf16, #tpu.memory_space<vmem>>, vector<16x256xbf16>
    %61 = vector.broadcast %19 : vector<1x256xbf16> to vector<16x256xbf16>
    %62 = arith.mulf %60, %61 : vector<16x256xbf16>
    %c6 = arith.constant 6 : index
    %c0_47 = arith.constant 0 : index
    %c0_48 = arith.constant 0 : index
    %63 = vector.load %arg5[%c6, %c0_47, %c0_48] : memref<9x16x16xbf16, #tpu.memory_space<vmem>>, vector<1x16x16xbf16>
    %64 = vector.shape_cast %63 : vector<1x16x16xbf16> to vector<16x16xbf16>
    %cst_49 = arith.constant dense<0.000000e+00> : vector<16x256xf32>
    %65 = tpu.matmul %64, %62, %cst_49 {dimension_numbers = #tpu.dot_dimension_numbers<[1], [0], [0], [1], [0, 0, 1, 1], [], []>} : vector<16x16xbf16>, vector<16x256xbf16>, vector<16x256xf32> -> vector<16x256xf32>
    %66 = arith.addf %59, %65 : vector<16x256xf32>
    %c0_50 = arith.constant 0 : index
    %c144 = arith.constant 144 : index
    %67 = vector.load %arg10[%c0_50, %c144] : memref<16x512xbf16, #tpu.memory_space<vmem>>, vector<16x256xbf16>
    %c7 = arith.constant 7 : index
    %c0_51 = arith.constant 0 : index
    %c0_52 = arith.constant 0 : index
    %68 = vector.load %arg5[%c7, %c0_51, %c0_52] : memref<9x16x16xbf16, #tpu.memory_space<vmem>>, vector<1x16x16xbf16>
    %69 = vector.shape_cast %68 : vector<1x16x16xbf16> to vector<16x16xbf16>
    %cst_53 = arith.constant dense<0.000000e+00> : vector<16x256xf32>
    %70 = tpu.matmul %69, %67, %cst_53 {dimension_numbers = #tpu.dot_dimension_numbers<[1], [0], [0], [1], [0, 0, 1, 1], [], []>} : vector<16x16xbf16>, vector<16x256xbf16>, vector<16x256xf32> -> vector<16x256xf32>
    %71 = arith.addf %66, %70 : vector<16x256xf32>
    %c0_54 = arith.constant 0 : index
    %c145 = arith.constant 145 : index
    %72 = vector.load %arg10[%c0_54, %c145] : memref<16x512xbf16, #tpu.memory_space<vmem>>, vector<16x256xbf16>
    %73 = vector.broadcast %20 : vector<1x256xbf16> to vector<16x256xbf16>
    %74 = arith.mulf %72, %73 : vector<16x256xbf16>
    %c8 = arith.constant 8 : index
    %c0_55 = arith.constant 0 : index
    %c0_56 = arith.constant 0 : index
    %75 = vector.load %arg5[%c8, %c0_55, %c0_56] : memref<9x16x16xbf16, #tpu.memory_space<vmem>>, vector<1x16x16xbf16>
    %76 = vector.shape_cast %75 : vector<1x16x16xbf16> to vector<16x16xbf16>
    %cst_57 = arith.constant dense<0.000000e+00> : vector<16x256xf32>
    %77 = tpu.matmul %76, %74, %cst_57 {dimension_numbers = #tpu.dot_dimension_numbers<[1], [0], [0], [1], [0, 0, 1, 1], [], []>} : vector<16x16xbf16>, vector<16x256xbf16>, vector<16x256xf32> -> vector<16x256xf32>
    %78 = arith.addf %71, %77 : vector<16x256xf32>
    %c0_58 = arith.constant 0 : index
    %c0_59 = arith.constant 0 : index
    %79 = vector.load %arg6[%c0_58, %c0_59] : memref<16x1xf32, #tpu.memory_space<vmem>>, vector<16x1xf32>
    %80 = vector.broadcast %79 : vector<16x1xf32> to vector<16x256xf32>
    %81 = arith.addf %78, %80 : vector<16x256xf32>
    %c0_60 = arith.constant 0 : index
    %c0_61 = arith.constant 0 : index
    %c0_62 = arith.constant 0 : index
    %82 = vector.load %arg9[%c0_60, %c0_61, %c0_62] : memref<1x16x256xf32, #tpu.memory_space<vmem>>, vector<1x16x256xf32>
    %83 = vector.shape_cast %82 : vector<1x16x256xf32> to vector<16x256xf32>
    %84 = vector.shape_cast %81 : vector<16x256xf32> to vector<1x16x256xf32>
    tpu.vector_store %arg9[%c0_60, %c0_61, %c0_62], %84 {strides = array<i32>} : memref<1x16x256xf32, #tpu.memory_space<vmem>>, vector<1x16x256xf32>,
    return
  }
  func.func @transform_0(%arg0: i32) -> (i32, i32, i32) {
    %c0_i32 = arith.constant 0 : i32
    %c0_i32_0 = arith.constant 0 : i32
    %c0_i32_1 = arith.constant 0 : i32
    return %arg0, %c0_i32, %c0_i32_0 : i32, i32, i32
  }
  func.func @transform_1(%arg0: i32) -> (i32, i32) {
    %c0_i32 = arith.constant 0 : i32
    %c0_i32_0 = arith.constant 0 : i32
    %c0_i32_1 = arith.constant 0 : i32
    return %c0_i32, %c0_i32_0 : i32, i32
  }
  func.func @transform_2(%arg0: i32) -> (i32, i32) {
    %c0_i32 = arith.constant 0 : i32
    %c0_i32_0 = arith.constant 0 : i32
    %c0_i32_1 = arith.constant 0 : i32
    return %c0_i32, %c0_i32_0 : i32, i32
  }
  func.func @transform_3(%arg0: i32) -> (i32, i32) {
    %c0_i32 = arith.constant 0 : i32
    %c0_i32_0 = arith.constant 0 : i32
    %c0_i32_1 = arith.constant 0 : i32
    return %c0_i32, %c0_i32_0 : i32, i32
  }
  func.func @transform_4(%arg0: i32) -> (i32, i32, i32) {
    %c0_i32 = arith.constant 0 : i32
    %c0_i32_0 = arith.constant 0 : i32
    %c0_i32_1 = arith.constant 0 : i32
    %c0_i32_2 = arith.constant 0 : i32
    return %c0_i32, %c0_i32_0, %c0_i32_1 : i32, i32, i32
  }
  func.func @transform_5(%arg0: i32) -> (i32, i32) {
    %c0_i32 = arith.constant 0 : i32
    %c0_i32_0 = arith.constant 0 : i32
    %c0_i32_1 = arith.constant 0 : i32
    return %c0_i32, %c0_i32_0 : i32, i32
  }
  func.func @transform_6(%arg0: i32) -> (i32, i32) {
    %c0_i32 = arith.constant 0 : i32
    %c0_i32_0 = arith.constant 0 : i32
    %c0_i32_1 = arith.constant 0 : i32
    return %c0_i32, %c0_i32_0 : i32, i32
  }
  func.func @transform_7(%arg0: i32) -> (i32, i32) {
    %c0_i32 = arith.constant 0 : i32
    %c0_i32_0 = arith.constant 0 : i32
    %c0_i32_1 = arith.constant 0 : i32
    return %c0_i32, %c0_i32_0 : i32, i32
  }
  func.func @transform_8(%arg0: i32) -> (i32, i32, i32) {
    %c0_i32 = arith.constant 0 : i32
    %c0_i32_0 = arith.constant 0 : i32
    %c0_i32_1 = arith.constant 0 : i32
    return %arg0, %c0_i32, %c0_i32_0 : i32, i32, i32
  }
}

</mosaic_0001>

<bundles_post_ra>
// kernel: tpu_custom_call.1
= control target key start
LH: loop header
LB: loop body
LE: loop exit
PB: predicated region body
PF: predicated region fallthrough
CT: control target
= control target key end

     0   :  { %13 = vsyncpa [#allocation4], 0  ;;  %s2020_s0 = inlined_call_operand.hbm [shape: f32[2,16,256], index: 0, kind: input, shape index: {}]   ;;  %s2021_s1 = inlined_call_operand.vmem [shape: bf16[16,16], index: 1, kind: input, shape index: {}]   ;;  %s2022_s2 = inlined_call_operand.vmem [shape: f32[16,1], index: 2, kind: input, shape index: {}]   ;;  %s2023_s3 = inlined_call_operand.vmem [shape: f32[16,1], index: 3, kind: input, shape index: {}]   ;;  %s2024_s4 = inlined_call_operand.hbm [shape: bf16[9,16,16], index: 4, kind: input, shape index: {}]   ;;  %s2025_s5 = inlined_call_operand.vmem [shape: f32[16,1], index: 5, kind: input, shape index: {}]   ;;  %s2026_s6 = inlined_call_operand.vmem [shape: bf16[1,256], index: 6, kind: input, shape index: {}]   ;;  %s2027_s7 = inlined_call_operand.vmem [shape: bf16[1,256], index: 7, kind: input, shape index: {}]   ;;  %s2028_s8 = inlined_call_operand.hbm [shape: f32[2,16,256], index: 8, kind: output, shape index: {}]  }
   0x1   :  { %15 = vsyncpa [#allocation4 + $0x1], 0 }
   0x2   :  { %16 = vsyncpa [#allocation7], 0 }
   0x3   :  { %17 = vsyncpa [#allocation5], 0 }
   0x4   :  { %19 = vsyncpa [#allocation5 + $0x1], 0  ;;  %s1688_s27 = smov 0   ;;  %s1690_s28 = smov 0  }
   0x5   :  { %s1692_s29 = smov 0   ;;  %s1694_s30 = smov 0  }
   0x6 LB: > { %s1709_s9 = sadd.s32 4294967295, %s1623_s30   ;;  %s1339_s10 = sadd.s32 4294967294, %s1623_s30   ;;  %s1623_s30 = sphi %s1694_s30, %s2048_s30   ;;  %s1619_s29 = sphi %s1692_s29, %s2051_s29   ;;  %s1615_s28 = sphi %s1690_s28, %s2050_s28   ;;  %s1611_s27 = sphi %s1688_s27, %s2049_s27  }
   0x7   : > { %p45_p0 = scmp.ne.s32.totalorder %s1615_s28, %s1611_s27  ;;  %p2029_p1 = scmp.eq.s32.totalorder %s1709_s9, 0 }
   0x8   : > { %p222_p3 = scmp.eq.s32.totalorder %s1339_s10, 1  ;;  %p1340_p5 = scmp.ge.s32.totalorder %s1623_s30, 1 }
   0x9   : > { %p1718_p4 = por %p2029_p1, %p45_p0  ;;  %p229_p7 = scmp.lt.s32.totalorder %s1623_s30, 3 }
   0xa   : > { %p1723_p6 = por %p222_p3, %p45_p0  ;;  %s1625_s14 = smov [#allocation6]  }
   0xb   : > { %s2034_s11 = scalar_select %p1718_p4, 1, 0 }
   0xc   : > { %s2035_s12 = scalar_select %p1723_p6, 1, 0 }
   0xd   : > { %p1728_p8 = pnand %p1340_p5, %p229_p7  ;;  %s250_s15 = sshll.u32 %s1625_s14, 4  ;;  %s1732_s15 = int_to_ptr.vmem [resolvable:$true] %s250_s15 }
   0xe   : > { %s1744_s17 = sadd.s32 1, %s1623_s30   ;;  %s32_s18 = sadd.s32 1, %s1619_s29 }
   0xf   : > { %s2036_s13 = scalar_select %p1728_p8, 1, 0 }
  0x10   : > { %p1419_p9 = pneg %p1728_p8  ;;  %2038 = sst [smem:[#allocation12_spill]] %s1744_s17 }
  0x11   : > { %s29_s19 = ssub.s32 %s1623_s30, %s1744_s17  ;;  %s1495_s22 = scalar_lea.hbm %s2024_s4, 1152 }
  0x12   : > { %p1739_p11 = pnand %p1419_p9, %p2029_p1  ;;  %p1496_p12 = scmp.ne.s32.totalorder %s2024_s4, %s1495_s22 }
  0x13   : > { %p1502_p5 = scmp.lt.u32.totalorder %s1495_s22, %s2024_s4 }
  0x14   : > { %p1497_p13 = pneg %p1739_p11 }
  0x16   : > { %p1498_p0 = pnand %p1497_p13, %p1496_p12 }
  0x18   : > { %p1499_p3 = pneg %p1498_p0 }
  0x1a   : > { %p1504_p7 = pnand %p1502_p5, %p1499_p3 }
  0x1c   : > { %1507 = shalt.err (!%p1504_p7)
}
  0x1d   : > { %s1508_s10 = scalar_lea.vmem %s1732_s15, 1152  ;;  %p1516_p2 = scmp.lt.s32.totalorder %s1732_s15, %s1732_s15 }
  0x1e   : > { %p1509_p9 = scmp.ne.s32.totalorder %s1732_s15, %s1508_s10  ;;  %p1517_p6 = scmp.lt.s32.totalorder %s1508_s10, %s1508_s10 }
  0x20   : > { %p1511_p10 = pnand %p1509_p9, %p1497_p13  ;;  %p1518_p4 = por %p1517_p6, %p1516_p2 }
  0x22   : > { %p1512_p1 = pneg %p1511_p10 }
  0x24   : > { %p1519_p8 = pnand %p1518_p4, %p1512_p1 }
  0x26   : > { %1522 = shalt.err (!%p1519_p8)
}
  0x27   : > { %s1626_s14 = smov 64   ;;  %s1627_s20 = smov 4  }
  0x28   : > { %1422 = dma.hbm_to_vmem [thread:$0]  (!%p1739_p11), %s2024_s4, 1152, %s1732_s15, [#allocation7], %s1626_s14, %s1626_s14, %s1627_s20  }
  0x29   : > { %p30_p2 = scmp.eq.s32.totalorder %s29_s19, 0  ;;  %p39_p1 = scmp.ne.s32.totalorder %s1619_s29, %s1615_s28 }
  0x2a   : > { %p40_p4 = scmp.eq.s32.totalorder %s1623_s30, 0  ;;  %p1432_p6 = scmp.lt.s32.totalorder %s1623_s30, 2 }
  0x2b   : > { %s1775_s23 = scalar_select %p30_p2, %s1619_s29, %s32_s18  }
  0x2c   : > { %p41_p8 = por %p40_p4, %p39_p1  ;;  %p2039_p10 = scmp.eq.s32.totalorder %s1709_s9, 1 }
  0x2d   : > { %s273_s25 = sand.u32 1, %s1619_s29   ;;  %s1377_s26 = sshll.u32 %s1623_s30, 9 }
  0x2e   : > { %p1779_p12 = por %p2039_p10, %p39_p1  ;;  %s1343_s10 = sshll.u32 %s273_s25, 5 }
  0x2f   : > { %s1788_s21 = scalar_lea.hbm %s2020_s0, %s1377_s26  ;;  %s277_s15 = scalar_lea.vmem [#allocation3], %s1343_s10 }
  0x30   : > { %s284_s18 = sshll.u32 %s277_s15, 4  ;;  %p1790_p11 = pnand %p1432_p6, %p41_p8  ;;  %s1794_s18 = int_to_ptr.vmem [resolvable:$true] %s284_s18 }
  0x31   : > { %s1796_s14 = scalar_lea.sflag [#allocation4], %s273_s25  ;;  %s1523_s20 = scalar_lea.hbm %s1788_s21, 512 }
  0x32   : > { %p1524_p13 = scmp.ne.s32.totalorder %s1788_s21, %s1523_s20  ;;  %p1525_p0 = pneg %p1790_p11 }
  0x33   : > { %s1528_s26 = scalar_lea.hbm %s2020_s0, 1024  ;;  %p1529_p7 = scmp.lt.u32.totalorder %s1788_s21, %s2020_s0 }
  0x34   : > { %p1526_p3 = pnand %p1525_p0, %p1524_p13  ;;  %p1530_p9 = scmp.lt.u32.totalorder %s1528_s26, %s1523_s20 }
  0x35   : > { %p1532_p1 = scmp.lt.u32.totalorder %s1523_s20, %s1788_s21 }
  0x36   : > { %p1527_p5 = pneg %p1526_p3  ;;  %p1531_p2 = por %p1530_p9, %p1529_p7 }
  0x38   : > { %p1533_p4 = por %p1532_p1, %p1531_p2 }
  0x3a   : > { %p1534_p6 = pnand %p1533_p4, %p1527_p5 }
  0x3c   : > { %1537 = shalt.err (!%p1534_p6)
}
  0x3d   : > { %s1538_s25 = scalar_lea.vmem %s1794_s18, 512  ;;  %s1628_s15 = smov [#allocation3]  }
  0x3e   : > { %p1539_p8 = scmp.ne.s32.totalorder %s1794_s18, %s1538_s25  ;;  %s1543_s17 = sshll.u32 %s1628_s15, 4  ;;  %s1544_s17 = int_to_ptr.vmem [resolvable:$false] %s1543_s17 }
  0x3f   : > { %s1545_s22 = scalar_lea.vmem %s1544_s17, 1024  ;;  %p1546_p3 = scmp.lt.s32.totalorder %s1794_s18, %s1544_s17 }
  0x40   : > { %p1541_p10 = pnand %p1539_p8, %p1525_p0  ;;  %p1547_p7 = scmp.lt.s32.totalorder %s1545_s22, %s1538_s25 }
  0x42   : > { %p1542_p13 = pneg %p1541_p10  ;;  %p1548_p9 = por %p1547_p7, %p1546_p3 }
  0x44   : > { %p1549_p2 = pnand %p1548_p9, %p1542_p13 }
  0x46   : > { %1552 = shalt.err (!%p1549_p2)
}
  0x47   : > { %s1629_s20 = smov 256   ;;  %s1630_s26 = smov 16  }
  0x48   : > { %1426 = dma.hbm_to_vmem [thread:$0]  (!%p1790_p11), %s1788_s21, 512, %s1794_s18, %s1796_s14, %s1629_s20, %s1629_s20, %s1630_s26  }
  0x49   : > { %p2042_p0 = scmp.ne.s32.totalorder %s2036_s13, 0 }
  0x4a   : > { %s1827_s10 = sand.u32 (!%p2042_p0), 1, %s1615_s28   ;;  %p2043_p5 = scmp.ne.s32.totalorder (!%p2042_p0), %s2034_s11, 0 }
  0x4b   : > { %296 = sbr.rel (%p2042_p0) target bundleno = 712 (0x2c8), region = 52  ;;  %s1347_s16 = sshll.u32 (!%p2042_p0), %s1827_s10, 5 }
  0x4c   : > { %s299_s25 = scalar_lea.sflag (!%p2042_p0), [#allocation4], %s1827_s10  ;;  %s302_s15 = scalar_lea.vmem (!%p2042_p0), [#allocation3], %s1347_s16 }
  0x52   : > { %1598 = dma.done.wait (%p2043_p5), %s299_s25, 512  }
  0x53   : > { %1600 = vsyncadd (%p2043_p5), %s299_s25, 4294966784  ;;  %p2044_p11 = scmp.eq.s32.totalorder %s1709_s9, 0 }
  0x55   : > { %1602 = dma.done.wait (%p2044_p11), [#allocation7], 1152   ;;  %p2045_p1 = pmov %p2044_p11 }
  0x56   : > { %v459_v0 = vlaneseq  ;;  %v1631_v1 = vmov 0   ;;  %v1632_v2 = vmov 1966171168   ;;  %v341_v6 = vld [vmem:[%s302_s15 + $0x8] sm:$0xff]  ;;  %v343_v7 = vld [vmem:[%s302_s15 + $0x18] sm:$0xff]  ;;  %v340_v8 = vld [vmem:[%s302_s15] sm:$0xff] }
  0x57   : > { %1604 = vsyncadd (%p2045_p1), [#allocation7], 4294966144  ;;  %389 = vmatprep.mubr.bf16.mxu0 %v1631_v1  ;;  %1484 = vset.pattern.permute.xlu1 %v1631_v1  ;;  %v457_v3 = vunpack.c.l.s4 %v1632_v2  ;;  %v345_v10 = vpack.c.bf16 %v343_v7, %v341_v6  ;;  %v342_v11 = vld [vmem:[%s302_s15 + $0x10] sm:$0xff]  ;;  %v1485_v13 = vld [vmem:[%s2021_s1] sm:$0xff]   ;;  %vm353_vm0 = vcmask 130048   ;;  %s1633_s21 = smov 1  }
  0x58   : > { %1483 = vset.pattern.permute.xlu0 %v1631_v1  ;;  %886 = vmatprep.mubr.bf16.mxu1 %v1631_v1  ;;  %v460_v5 = vshrl.u32 %v459_v0, 7  ;;  %v344_v12 = vpack.c.bf16 %v342_v11, %v340_v8  ;;  %v416_v14 = vld [vmem:[%s2023_s3] sm:$0xff]  ;;  %v417_v17 = vld [vmem:[%s2023_s3 + $0x8] sm:$0xff]  ;;  %s1634_s18 = smov 111   ;;  %s1635_s19 = smov 15   ;;  %vm788_vm1 = vcmask 7168  }
  0x59   : > { %v458_v4 = vunpack.c.0.s8 %v457_v3  ;;  %v400_v15 = vld [vmem:[%s2022_s2] sm:$0xff]  ;;  %357 = vmatprep.subr.bf16.mxu0 %v345_v10  ;;  %420 = vperm.xlu1 %1484, %v416_v14   ;;  %v401_v18 = vld [vmem:[%s2022_s2 + $0x8] sm:$0xff]  ;;  %s1636_s14 = smov 113   ;;  %s1637_s17 = smov 127   ;;  %vm490_vm2 = vcmask 908288   ;;  %vm701_vm3 = vcmask 121856  }
  0x5a   : > { %v475_v16 = vsub.s32 0, %v460_v5  ;;  %v1357_v19 = vld.sshfl [vmem:[%s2027_s7] sm:$0x11 pattern:$0x75316420]  ;;  %358 = vmatpush1.bf16.msra.mxu0 %v344_v12  ;;  %404 = vperm.xlu0 %1483, %v400_v15   ;;  %s1638_s22 = smov 17  }
  0x5b   : > { %v461_v9 = vsub.s32 %v458_v4, %v460_v5  ;;  %v641_v20 = vcombine.high %v1357_v19, %v1357_v19  ;;  %v1352_v22 = vld.sshfl [vmem:[%s2026_s6] sm:$0x11 pattern:$0x75316420]  ;;  %s1639_s20 = smov 16   ;;  %vm676_vm4 = vcmask 924672  }
  0x5c   : > { %v455_v23 = vcombine.high %v1352_v22, %v1352_v22  ;;  %v1486_v63 = vld [vmem:[#allocation6 + $0x20] sm:$0xff]   ;;  %s1640_s26 = smov 112   ;;  %vm763_vm5 = vcmask 1039360   ;;  %vm582_vm6 = vcmask 138240   ;;  %vm1085_vm7 = vcmask 916480  }
  0x5d   : > { %v648_v21 = vrot.slane %v1357_v19, %v461_v9  ;;  %v462_v24 = vrot.slane %v1352_v22, %v461_v9  ;;  %v655_v25 = vrot.slane %v641_v20, %v461_v9  ;;  %1351 = vmatmul.mubr.msk.bf16.vlgmr.msra.gmra.mrb[0].mxu0 %vm353_vm0, %v1485_v13  ;;  %425 = vperm.xlu1 %1484, %v417_v17  }
  0x5e   : > { %v469_v27 = vrot.slane %v455_v23, %v461_v9  ;;  %409 = vperm.xlu0 %1483, %v401_v18   ;;  %557 = vmatprep.mubr.bf16.mxu0 %v1631_v1 }
  0x5f   : > { %v657_v26 = vpack.i.b16 %v648_v21, %v648_v21  ;;  %v664_v28 = vpack.i.b16 %v655_v25, %v655_v25  ;;  %v471_v30 = vpack.i.b16 %v462_v24, %v462_v24 }
  0x60   : > { %v478_v31 = vpack.i.b16 %v469_v27, %v469_v27 }
  0x61   : > { %v662_v29 = vrot.slane %v657_v26, %v475_v16  ;;  %v669_v32 = vrot.slane %v664_v28, %v475_v16  ;;  %v476_v34 = vrot.slane %v471_v30, %v475_v16 }
  0x62   : > { %v483_v33 = vrot.slane %v478_v31, %v475_v16  ;;  %v1223_v31 = vld [vmem:[%s2025_s5 + $0x8] sm:$0xff] }
  0x63   : > { %906 = vrot.lane.b32.xlu1 %v669_v32, %s1633_s21  ;;  %904 = vrot.lane.b32.xlu0 %v662_v29, %s1633_s21 }
  0x67   : > { %488 = vrot.lane.b32.xlu1 %v483_v33, %s1634_s18  ;;  %486 = vrot.lane.b32.xlu0 %v476_v34, %s1634_s18 }
  0x6b   : > { %988 = vrot.lane.b32.xlu1 %v483_v33, %s1635_s19  ;;  %986 = vrot.lane.b32.xlu0 %v476_v34, %s1635_s19 }
  0x6f   : > { %674 = vrot.lane.b32.xlu1 %v669_v32, %s1636_s14  ;;  %672 = vrot.lane.b32.xlu0 %v662_v29, %s1636_s14 }
  0x73   : > { %761 = vrot.lane.b32.xlu1 %v483_v33, %s1637_s17  ;;  %759 = vrot.lane.b32.xlu0 %v476_v34, %s1637_s17 }
  0x77   : > { %1142 = vrot.lane.b32.xlu1 %v669_v32, %s1638_s22  ;;  %1140 = vrot.lane.b32.xlu0 %v662_v29, %s1638_s22  ;;  %v1222_v32 = vld [vmem:[%s2025_s5] sm:$0xff] }
  0xd8   : > { %v421_v35 = vpop.permute.xlu1 %420 }
  0xd9   : > { %v405_v39 = vpop.permute.xlu0 %404 }
  0xdc   : > { %v426_v36 = vpop.permute.xlu1 %425 }
  0xdd   : > { %v410_v43 = vpop.permute.xlu0 %409 }
  0xe0   : > { %v907_v37 = vpop.permute.xlu1 %906 }
  0xe1   : > { %v914_v38 = vmul.bf16 0, %v907_v37  ;;  %v905_v57 = vpop.permute.xlu0 %904 }
  0xe2   : > { %v908_v61 = vsel %vm788_vm1, %v905_v57, %v907_v37 }
  0xe3   : > { %930 = vrot.lane.b32.xlu1 %v914_v38, %s1637_s17 }
  0xe4   : > { %v489_v58 = vpop.permute.xlu1 %488 }
  0xe5   : > { %v487_v2 = vpop.permute.xlu0 %486 }
  0xe6   : > { %v491_v5 = vsel %vm490_vm2, %v487_v2, %v489_v58  ;;  %v495_v13 = vmul.bf16 0, %v487_v2  ;;  %v1491_v2 = vld [vmem:[#allocation6 + $0x38] sm:$0xff]  }
  0xe8   : > { %v989_v3 = vpop.permute.xlu1 %988 }
  0xe9   : > { %v996_v4 = vmul.bf16 0, %v989_v3  ;;  %v987_v6 = vpop.permute.xlu0 %986 }
  0xea   : > { %v990_v8 = vsel %vm701_vm3, %v987_v6, %v989_v3 }
  0xec   : > { %v675_v12 = vpop.permute.xlu1 %674 }
  0xed   : > { %v673_v14 = vpop.permute.xlu0 %672 }
  0xee   : > { %v677_v15 = vsel %vm676_vm4, %v673_v14, %v675_v12  ;;  %v681_v22 = vmul.bf16 0, %v673_v14  ;;  %v1493_v14 = vld [vmem:[#allocation6 + $0x40] sm:$0xff]  }
  0xf0   : > { %v762_v16 = vpop.permute.xlu1 %761 }
  0xf1   : > { %v760_v19 = vpop.permute.xlu0 %759 }
  0xf2   : > { %v764_v23 = vsel %vm763_vm5, %v760_v19, %v762_v16  ;;  %v768_v30 = vmul.bf16 0, %v760_v19 }
  0xf4   : > { %v1143_v20 = vpop.permute.xlu1 %1142 }
  0xf5   : > { %v1150_v21 = vmul.bf16 0, %v1143_v20  ;;  %v1141_v24 = vpop.permute.xlu0 %1140 }
  0xf6   : > { %v1144_v27 = vsel %vm582_vm6, %v1141_v24, %v1143_v20 }
 0x130   : > { %v391_v40 = vpop.f32.mrb[0].mxu0 }
 0x131   : > { %v412_v41 = vmul.f32 %v405_v39, %v391_v40  ;;  %v393_v42 = vpop.f32.mrb[1].mxu0 }
 0x132   : > { %v413_v44 = vmul.f32 %v405_v39, %v393_v42  ;;  %v395_v45 = vpop.f32.mrb[2].mxu0 }
 0x133   : > { %v428_v46 = vadd.f32 %v421_v35, %v412_v41  ;;  %v414_v47 = vmul.f32 %v410_v43, %v395_v45  ;;  %v397_v48 = vpop.f32.mrb[3].mxu0  ;;  %v1487_v41 = vld [vmem:[#allocation6 + $0x28] sm:$0xff]  }
 0x134   : > { %v429_v49 = vadd.f32 %v421_v35, %v413_v44  ;;  %v415_v50 = vmul.f32 %v410_v43, %v397_v48  ;;  %v1488_v45 = vld [vmem:[#allocation6 + $0x8] sm:$0xff]  }
 0x135   : > { %v430_v51 = vadd.f32 %v426_v36, %v414_v47  ;;  %v432_v53 = vmax.f32 %v428_v46, 0.0 }
 0x136   : > { %v431_v52 = vadd.f32 %v426_v36, %v415_v50  ;;  %v433_v55 = vmax.f32 %v429_v49, 0.0 }
 0x137   : > { %v434_v54 = vmax.f32 %v430_v51, 0.0 }
 0x138   : > { %v435_v56 = vmax.f32 %v431_v52, 0.0 }
 0x139   : > { %v1881_v59 = vpack.c.bf16 %v434_v54, %v432_v53  ;;  %v1489_v53 = vld [vmem:[#allocation6 + $0x30] sm:$0xff]  }
 0x13a   : > { %v1883_v60 = vpack.c.bf16 %v435_v56, %v433_v55 }
 0x13b   : > { %513 = vrot.lane.b32.xlu0 %v1881_v59, %s1639_s20  ;;  %v912_v0 = vmul.bf16 %v905_v57, %v1881_v59  ;;  %v496_v7 = vmul.bf16 %v491_v5, %v1881_v59  ;;  %v994_v11 = vmul.bf16 %v987_v6, %v1881_v59  ;;  %v682_v17 = vmul.bf16 %v677_v15, %v1881_v59  ;;  %v1490_v57 = vld [vmem:[#allocation6] sm:$0xff]   ;;  %v1492_v6 = vld [vmem:[#allocation6 + $0x10] sm:$0xff]  }
 0x13c   : > { %515 = vrot.lane.b32.xlu1 %v1883_v60, %s1639_s20  ;;  %854 = vmatprep.subr.bf16.mxu1 %v1883_v60  ;;  %v913_v62 = vmul.bf16 %v908_v61, %v1883_v60  ;;  %v497_v9 = vmul.bf16 %v489_v58, %v1883_v60  ;;  %v995_v10 = vmul.bf16 %v990_v8, %v1883_v60 }
 0x13d   : > { %855 = vmatpush1.bf16.msra.mxu1 %v1881_v59  ;;  %v683_v18 = vmul.bf16 %v675_v12, %v1883_v60  ;;  %v769_v25 = vmul.bf16 %v764_v23, %v1881_v59  ;;  %v770_v26 = vmul.bf16 %v762_v16, %v1883_v60  ;;  %v1149_v28 = vmul.bf16 %v1144_v27, %v1883_v60 }
 0x13e   : > { %v1148_v29 = vmul.bf16 %v1141_v24, %v1881_v59 }
 0x13f   : > { %928 = vrot.lane.b32.xlu0 %v913_v62, %s1637_s17 }
 0x140   : > { %926 = vrot.lane.b32.xlu1 %v912_v0, %s1637_s17  ;;  %1363 = vmatmul.mubr.msk.bf16.vlgmr.msra.gmra.mrb[0].mxu1 %vm353_vm0, %v1486_v63 }
 0x141   : > { %971 = vmatprep.mubr.bf16.mxu1 %v1631_v1 }
 0x143   : > { %511 = vrot.lane.b32.xlu0 %v1631_v1, %s1639_s20 }
 0x144   : > { %1012 = vrot.lane.b32.xlu1 %v996_v4, %s1636_s14 }
 0x147   : > { %578 = vrot.lane.b32.xlu0 %v496_v7, %s1638_s22 }
 0x148   : > { %580 = vrot.lane.b32.xlu1 %v497_v9, %s1638_s22 }
 0x14b   : > { %1010 = vrot.lane.b32.xlu0 %v995_v10, %s1636_s14 }
 0x14c   : > { %1008 = vrot.lane.b32.xlu1 %v994_v11, %s1636_s14 }
 0x14f   : > { %576 = vrot.lane.b32.xlu0 %v495_v13, %s1638_s22 }
 0x150   : > { %1083 = vrot.lane.b32.xlu1 %v1631_v1, %s1640_s26 }
 0x153   : > { %697 = vrot.lane.b32.xlu0 %v682_v17, %s1635_s19  ;;  %v1494_v17 = vld [vmem:[#allocation6 + $0x18] sm:$0xff]  }
 0x154   : > { %699 = vrot.lane.b32.xlu1 %v683_v18, %s1635_s19 }
 0x155   : > { %v931_v33 = vpop.permute.xlu1 %930 }
 0x157   : > { %1081 = vrot.lane.b32.xlu0 %v1883_v60, %s1640_s26 }
 0x158   : > { %1079 = vrot.lane.b32.xlu1 %v1881_v59, %s1640_s26  ;;  %s1641_s26 = smov [#allocation8]  }
 0x159   : > { %s1557_s25 = sshll.u32 %s1641_s26, 4  ;;  %s1558_s25 = int_to_ptr.vmem [resolvable:$false] %s1557_s25 }
 0x15a   : > { %s1559_s15 = scalar_lea.vmem %s1558_s25, 1024 }
 0x15b   : > { %695 = vrot.lane.b32.xlu0 %v681_v22, %s1635_s19  ;;  %s1378_s19 = sshll.u32 %s1709_s9, 9  ;;  %s1243_s9 = scalar_lea.sflag [#allocation5], %s1827_s10 }
 0x15c   : > { %1166 = vrot.lane.b32.xlu1 %v1150_v21, %s1634_s18  ;;  %s1975_s17 = scalar_lea.hbm %s2028_s8, %s1378_s19 }
 0x15f   : > { %784 = vrot.lane.b32.xlu0 %v769_v25, %s1633_s21 }
 0x160   : > { %786 = vrot.lane.b32.xlu1 %v770_v26, %s1633_s21 }
 0x163   : > { %1164 = vrot.lane.b32.xlu0 %v1149_v28, %s1634_s18 }
 0x164   : > { %1162 = vrot.lane.b32.xlu1 %v1148_v29, %s1634_s18 }
 0x167   : > { %782 = vrot.lane.b32.xlu0 %v768_v30, %s1633_s21  ;;  %s338_s21 = scalar_lea.vmem [#allocation8], %s1347_s16 }
 0x168   : > { %1231 = vperm.xlu1 %1484, %v1223_v31   ;;  %s1256_s18 = sshll.u32 %s338_s21, 4  ;;  %s1970_s18 = int_to_ptr.vmem [resolvable:$true] %s1256_s18 }
 0x169   : > { %s1553_s22 = scalar_lea.vmem %s1970_s18, 512  ;;  %p1560_p10 = scmp.lt.s32.totalorder %s1970_s18, %s1558_s25 }
 0x16a   : > { %p1554_p4 = scmp.ne.s32.totalorder %s1970_s18, %s1553_s22  ;;  %p1561_p13 = scmp.lt.s32.totalorder %s1559_s15, %s1553_s22 }
 0x16b   : > { %1226 = vperm.xlu0 %1483, %v1222_v32  }
 0x16c   : > { %p1555_p6 = pnand %p1554_p4, %p1779_p12  ;;  %p1562_p3 = por %p1561_p13, %p1560_p10 }
 0x16e   : > { %p1556_p8 = pneg %p1555_p6 }
 0x170   : > { %p1563_p7 = pnand %p1562_p3, %p1556_p8 }
 0x1ad   : > { %v514_v34 = vpop.permute.xlu0 %513 }
 0x1ae   : > { %v516_v35 = vpop.permute.xlu1 %515 }
 0x1af   : > { %v519_v36 = vsel %vm353_vm0, %v514_v34, %v516_v35 }
 0x1b0   : > { %525 = vmatprep.subr.bf16.mxu0 %v519_v36 }
 0x1b1   : > { %v929_v37 = vpop.permute.xlu0 %928 }
 0x1b2   : > { %v927_v38 = vpop.permute.xlu1 %926  ;;  %v933_v39 = vsel %vm763_vm5, %v929_v37, %v931_v33 }
 0x1b3   : > { %v932_v40 = vsel %vm763_vm5, %v927_v38, %v929_v37  ;;  %939 = vmatprep.subr.bf16.mxu1 %v933_v39 }
 0x1b4   : > { %940 = vmatpush1.bf16.msra.mxu1 %v932_v40 }
 0x1b5   : > { %v512_v42 = vpop.permute.xlu0 %511 }
 0x1b6   : > { %v518_v43 = vsel %vm353_vm0, %v512_v42, %v514_v34  ;;  %v1013_v44 = vpop.permute.xlu1 %1012 }
 0x1b7   : > { %526 = vmatpush1.bf16.msra.mxu0 %v518_v43  ;;  %1365 = vmatmul.mubr.msk.bf16.vlgmr.msra.gmra.mrb[0].mxu1 %vm353_vm0, %v1487_v41 }
 0x1b8   : > { %1053 = vmatprep.mubr.bf16.mxu1 %v1631_v1 }
 0x1b9   : > { %v579_v46 = vpop.permute.xlu0 %578 }
 0x1ba   : > { %1354 = vmatmul.mubr.msk.bf16.vlgmr.msra.gmra.mrb[4].mxu0 %vm353_vm0, %v1488_v45  ;;  %v581_v47 = vpop.permute.xlu1 %580 }
 0x1bb   : > { %v584_v48 = vsel %vm582_vm6, %v579_v46, %v581_v47  ;;  %622 = vmatprep.mubr.bf16.mxu0 %v1631_v1 }
 0x1bc   : > { %590 = vmatprep.subr.bf16.mxu0 %v584_v48 }
 0x1bd   : > { %v1011_v49 = vpop.permute.xlu0 %1010 }
 0x1be   : > { %v1009_v50 = vpop.permute.xlu1 %1008  ;;  %v1015_v51 = vsel %vm676_vm4, %v1011_v49, %v1013_v44 }
 0x1bf   : > { %v1014_v52 = vsel %vm676_vm4, %v1009_v50, %v1011_v49  ;;  %1021 = vmatprep.subr.bf16.mxu1 %v1015_v51 }
 0x1c0   : > { %1022 = vmatpush1.bf16.msra.mxu1 %v1014_v52 }
 0x1c1   : > { %v577_v54 = vpop.permute.xlu0 %576 }
 0x1c2   : > { %v583_v55 = vsel %vm582_vm6, %v577_v54, %v579_v46  ;;  %v1084_v56 = vpop.permute.xlu1 %1083 }
 0x1c3   : > { %591 = vmatpush1.bf16.msra.mxu0 %v583_v55  ;;  %1367 = vmatmul.mubr.msk.bf16.vlgmr.msra.gmra.mrb[0].mxu1 %vm353_vm0, %v1489_v53 }
 0x1c4   : > { %1125 = vmatprep.mubr.bf16.mxu1 %v1631_v1 }
 0x1c5   : > { %v698_v58 = vpop.permute.xlu0 %697 }
 0x1c6   : > { %1356 = vmatmul.mubr.msk.bf16.vlgmr.msra.gmra.mrb[4].mxu0 %vm353_vm0, %v1490_v57  ;;  %v700_v59 = vpop.permute.xlu1 %699 }
 0x1c7   : > { %v703_v60 = vsel %vm701_vm3, %v698_v58, %v700_v59  ;;  %741 = vmatprep.mubr.bf16.mxu0 %v1631_v1 }
 0x1c8   : > { %709 = vmatprep.subr.bf16.mxu0 %v703_v60 }
 0x1c9   : > { %v1082_v61 = vpop.permute.xlu0 %1081 }
 0x1ca   : > { %v1080_v62 = vpop.permute.xlu1 %1079  ;;  %v1087_v63 = vsel %vm1085_vm7, %v1082_v61, %v1084_v56 }
 0x1cb   : > { %v1086_v0 = vsel %vm1085_vm7, %v1080_v62, %v1082_v61  ;;  %1093 = vmatprep.subr.bf16.mxu1 %v1087_v63 }
 0x1cc   : > { %1094 = vmatpush1.bf16.msra.mxu1 %v1086_v0 }
 0x1cd   : > { %v696_v3 = vpop.permute.xlu0 %695 }
 0x1ce   : > { %v702_v4 = vsel %vm701_vm3, %v696_v3, %v698_v58  ;;  %v1167_v5 = vpop.permute.xlu1 %1166 }
 0x1cf   : > { %710 = vmatpush1.bf16.msra.mxu0 %v702_v4  ;;  %1369 = vmatmul.mubr.msk.bf16.vlgmr.msra.gmra.mrb[0].mxu1 %vm353_vm0, %v1491_v2 }
 0x1d0   : > { %1207 = vmatprep.mubr.bf16.mxu1 %v1631_v1 }
 0x1d1   : > { %v785_v7 = vpop.permute.xlu0 %784 }
 0x1d2   : > { %1359 = vmatmul.mubr.msk.bf16.vlgmr.msra.gmra.mrb[4].mxu0 %vm353_vm0, %v1492_v6  ;;  %v787_v8 = vpop.permute.xlu1 %786 }
 0x1d3   : > { %v790_v9 = vsel %vm788_vm1, %v785_v7, %v787_v8  ;;  %828 = vmatprep.mubr.bf16.mxu0 %v1631_v1 }
 0x1d4   : > { %796 = vmatprep.subr.bf16.mxu0 %v790_v9 }
 0x1d5   : > { %v1165_v10 = vpop.permute.xlu0 %1164 }
 0x1d6   : > { %v1163_v11 = vpop.permute.xlu1 %1162  ;;  %v1169_v12 = vsel %vm490_vm2, %v1165_v10, %v1167_v5 }
 0x1d7   : > { %v1168_v13 = vsel %vm490_vm2, %v1163_v11, %v1165_v10  ;;  %1175 = vmatprep.subr.bf16.mxu1 %v1169_v12 }
 0x1d8   : > { %1176 = vmatpush1.bf16.msra.mxu1 %v1168_v13 }
 0x1d9   : > { %v783_v15 = vpop.permute.xlu0 %782 }
 0x1da   : > { %v789_v16 = vsel %vm788_vm1, %v783_v15, %v785_v7 }
 0x1db   : > { %797 = vmatpush1.bf16.msra.mxu0 %v789_v16  ;;  %1371 = vmatmul.mubr.msk.bf16.vlgmr.msra.gmra.mrb[0].mxu1 %vm353_vm0, %v1493_v14 }
 0x1de   : > { %1361 = vmatmul.mubr.msk.bf16.vlgmr.msra.gmra.mrb[4].mxu0 %vm353_vm0, %v1494_v17 }
 0x1e7   : > { %v1232_v30 = vpop.permute.xlu1 %1231 }
 0x1ea   : > { %v1227_v24 = vpop.permute.xlu0 %1226 }
 0x2ae   : > { %v1209_v1 = vpop.f32.mrb[0].mxu1 }
 0x2af   : > { %v1211_v18 = vpop.f32.mrb[1].mxu1 }
 0x2b0   : > { %v1213_v19 = vpop.f32.mrb[2].mxu1 }
 0x2b1   : > { %v830_v20 = vpop.f32.mrb[4].mxu0  ;;  %v1215_v21 = vpop.f32.mrb[3].mxu1 }
 0x2b2   : > { %v1379_v22 = vadd.f32 %v1209_v1, %v830_v20  ;;  %v832_v23 = vpop.f32.mrb[5].mxu0 }
 0x2b3   : > { %v1380_v25 = vadd.f32 %v1211_v18, %v832_v23  ;;  %v834_v26 = vpop.f32.mrb[6].mxu0 }
 0x2b4   : > { %v1234_v27 = vadd.f32 %v1379_v22, %v1227_v24  ;;  %v1381_v28 = vadd.f32 %v1213_v19, %v834_v26  ;;  %v836_v29 = vpop.f32.mrb[7].mxu0 }
 0x2b5   : > { %v1235_v31 = vadd.f32 %v1380_v25, %v1227_v24  ;;  %v1382_v32 = vadd.f32 %v1215_v21, %v836_v29 }
 0x2b6   : > { %1238 = vst [vmem:[%s338_s21] sm:$0xff] %v1234_v27  ;;  %v1236_v33 = vadd.f32 %v1381_v28, %v1232_v30 }
 0x2b7   : > { %1239 = vst [vmem:[%s338_s21 + $0x8] sm:$0xff] %v1235_v31  ;;  %v1237_v34 = vadd.f32 %v1382_v32, %v1232_v30 }
 0x2b8   : > { %1240 = vst [vmem:[%s338_s21 + $0x10] sm:$0xff] %v1236_v33 }
 0x2b9   : > { %1241 = vst [vmem:[%s338_s21 + $0x18] sm:$0xff] %v1237_v34 }
 0x2ba   : > { %1566 = shalt.err (!%p1563_p7)
}
 0x2bb   : > { %s1567_s11 = scalar_lea.hbm %s1975_s17, 512  ;;  %s1571_s19 = scalar_lea.hbm %s2028_s8, 1024 }
 0x2bc   : > { %p1568_p9 = scmp.ne.s32.totalorder %s1975_s17, %s1567_s11  ;;  %p1572_p5 = scmp.lt.u32.totalorder %s1975_s17, %s2028_s8 }
 0x2bd   : > { %p1573_p11 = scmp.lt.u32.totalorder %s1571_s19, %s1567_s11  ;;  %p1575_p4 = scmp.lt.u32.totalorder %s1567_s11, %s1975_s17 }
 0x2be   : > { %p1569_p2 = pnand %p1568_p9, %p1779_p12 }
 0x2bf   : > { %p1574_p1 = por %p1573_p11, %p1572_p5 }
 0x2c0   : > { %p1570_p0 = pneg %p1569_p2 }
 0x2c1   : > { %p1576_p6 = por %p1575_p4, %p1574_p1 }
 0x2c3   : > { %p1577_p8 = pnand %p1576_p6, %p1570_p0 }
 0x2c5   : > { %1580 = shalt.err (!%p1577_p8)
}
 0x2c6   : > { %s1642_s22 = smov 256  }
 0x2c7   : > { %1417 = dma.vmem_to_hbm [thread:$0]  (%p1779_p12), %s1970_s18, 512, %s1975_s17, %s1243_s9, %s1642_s22, %s1642_s22, %s1639_s20  }
 0x2c8 PF: > { %s1271_s26 = sand.u32 1, %s1611_s27   ;;  %p2046_p10 = scmp.ne.s32.totalorder %s2035_s12, 0 }
 0x2c9   : > { %p2047_p13 = scmp.ge.s32.totalorder %s1623_s30, 2  ;;  %s1272_s25 = scalar_lea.sflag [#allocation5], %s1271_s26 }
 0x2cb   : > { %p1428_p3 = pnand %p2047_p13, %p2046_p10 }
 0x2cd   : > { %1606 = dma.done.wait (!%p1428_p3), %s1272_s25, 512  }
 0x2ce   : > { %1608 = vsyncadd (!%p1428_p3), %s1272_s25, 4294966784  ;;  %s2048_s30 = sld [smem:[#allocation12_spill]]  ;;  %s2049_s27 = smov %s1615_s28 }
 0x2cf   : > { %s2050_s28 = smov %s1619_s29  ;;  %s2051_s29 = smov %s1775_s23 }
 0x2d4   : > { %p22_p7 = scmp.ge.s32.totalorder %s2048_s30, 4  }
 0x2d6   :  { %24 = sbr.rel (!%p22_p7) target bundleno = 6 (0x6), region = 109 }
 0x2dd   :  { %1277 = vsyncpa [#allocation4], 1 }
 0x2de   :  { %1279 = vsyncpa [#allocation4 + $0x1], 1 }
 0x2df   :  { %1280 = vsyncpa [#allocation7], 1 }
 0x2e0   :  { %1281 = vsyncpa [#allocation5], 1 }
 0x2e1   :  { %1283 = vsyncpa [#allocation5 + $0x1], 1 }

</bundles_post_ra>
